<compile_context>
chip_gen: v7x
topology: tpu7x:2x2x1
jax: 0.10.0
libtpu: 0.0.40
codegen_flags: <defaults>
</compile_context>

<pallas_src>
import functools

import jax
import jax.numpy as jnp
from jax import lax
from jax.experimental import pallas as pl
from jax.experimental.pallas import tpu as pltpu


def _channel_attention_kernel(x_ref, w1t_ref, w2t_ref, out_ref,
                              sum_ref, max_ref, *, hw, t_hw):
    """One (batch-block, hw-tile) grid step.

    x_ref:   (b_tile, C, t_hw)  input tile, native dtype (cast to f32 here)
    w1t_ref: (C, hidden)        fc1 weight, pre-transposed, f32 (resident)
    w2t_ref: (hidden, C)        fc2 weight, pre-transposed, f32 (resident)
    out_ref: (b_tile, C)        sigmoid(channel attention)
    sum_ref/max_ref: (b_tile, C) f32 accumulators (VMEM scratch)
    """
    hw_id = pl.program_id(1)

    @pl.when(hw_id == 0)
    def _init():
        sum_ref[...] = jnp.zeros_like(sum_ref)
        max_ref[...] = jnp.full_like(max_ref, -jnp.inf)

    # Stream the tile in its native dtype; accumulate in f32.
    x = x_ref[...].astype(jnp.float32)                    # (b_tile, C, t_hw)

    if hw % t_hw != 0:
        # Remainder tile: mask out-of-range lanes (0 for sum, -inf for max).
        lane = lax.broadcasted_iota(jnp.int32, x.shape, dimension=2)
        valid = (hw_id * t_hw + lane) < hw
        x_sum = jnp.where(valid, x, 0.0)
        x_max = jnp.where(valid, x, -jnp.inf)
    else:
        x_sum = x
        x_max = x

    sum_ref[...] = sum_ref[...] + jnp.sum(x_sum, axis=-1)
    max_ref[...] = jnp.maximum(max_ref[...], jnp.max(x_max, axis=-1))

    @pl.when(hw_id == pl.num_programs(1) - 1)
    def _finalize():
        b = sum_ref.shape[0]
        avg = sum_ref[...] * (1.0 / hw)                   # true mean over H*W
        mx = max_ref[...]
        # Stack both pooled branches -> a single fc1 matmul + ReLU.
        pooled = jnp.concatenate([avg, mx], axis=0)       # (2b, C)
        h = jnp.maximum(
            jnp.dot(pooled, w1t_ref[...],
                    preferred_element_type=jnp.float32), 0.0)   # (2b, hidden)
        # fc2 is linear with no bias: fc2(ha) + fc2(hm) == fc2(ha + hm).
        h_sum = h[:b] + h[b:]                             # (b, hidden)
        o = jnp.dot(h_sum, w2t_ref[...],
                    preferred_element_type=jnp.float32)   # (b, C)
        out_ref[...] = jax.nn.sigmoid(o).astype(out_ref.dtype)


def _pick_hw_tile(hw, b_tile, c, dtype_bytes,
                  vmem_budget_bytes=24 * 1024 * 1024):
    """Largest multiple-of-128 HW tile whose double-buffered x slab fits budget."""
    per_lane = 2 * b_tile * c * dtype_bytes               # 2 pipeline buffers
    max_t = max(128, vmem_budget_bytes // per_lane)
    target = max(128, min(2048, (max_t // 128) * 128))
    if hw <= target:
        return hw       # single full-extent tile (always satisfies tiling rules)
    return target       # multiple of 128; remainder tile masked in-kernel


def channel_attention(x_nchw, w1, w2, *, hw_tile=None):
    """x_nchw: (B, C, H, W); w1: (C//16, C); w2: (C, C//16). Returns (B, C, 1, 1)."""
    B, C, H, W = x_nchw.shape
    hidden = w1.shape[0]
    assert w1.shape == (hidden, C) and w2.shape == (C, hidden)

    hw = H * W
    # NOTE: no dtype cast here — x is streamed in its native dtype (bf16 in a
    # real PVT halves the HBM traffic); the kernel upcasts per tile.
    x_flat = x_nchw.reshape(B, C, hw)

    w1t = jnp.transpose(w1).astype(jnp.float32)           # (C, hidden)
    w2t = jnp.transpose(w2).astype(jnp.float32)           # (hidden, C)

    # Batch blocking: gives a 'parallel' grid axis (megacore / v7x 2-TC
    # sharding) when B is large; degenerates to one block for small B.
    b_tile = 8 if (B % 8 == 0 and B > 8) else B
    n_b = B // b_tile

    if hw_tile is None:
        hw_tile = _pick_hw_tile(hw, b_tile, C, x_flat.dtype.itemsize)
    n_hw = pl.cdiv(hw, hw_tile)

    kernel = functools.partial(_channel_attention_kernel, hw=hw, t_hw=hw_tile)

    out = pl.pallas_call(
        kernel,
        out_shape=jax.ShapeDtypeStruct((B, C), x_nchw.dtype),
        grid_spec=pltpu.PrefetchScalarGridSpec(
            num_scalar_prefetch=0,
            grid=(n_b, n_hw),
            in_specs=[
                pl.BlockSpec((b_tile, C, hw_tile), lambda i, j: (i, 0, j)),
                pl.BlockSpec((C, hidden), lambda i, j: (0, 0)),   # resident
                pl.BlockSpec((hidden, C), lambda i, j: (0, 0)),   # resident
            ],
            out_specs=pl.BlockSpec((b_tile, C), lambda i, j: (i, 0)),
            scratch_shapes=[
                pltpu.VMEM((b_tile, C), jnp.float32),   # running sum
                pltpu.VMEM((b_tile, C), jnp.float32),   # running max
            ],
        ),
        compiler_params=pltpu.CompilerParams(
            dimension_semantics=("parallel", "arbitrary"),
            vmem_limit_bytes=48 * 1024 * 1024,
        ),
    )(x_flat, w1t, w2t)

    return out.reshape(B, C, 1, 1)


def reference_channel_attention(x_nchw, w1, w2):
    """Pure-JAX reference matching the PyTorch forward."""
    B, C, H, W = x_nchw.shape
    xf = x_nchw.astype(jnp.float32)
    avg = jnp.mean(xf, axis=(2, 3))                       # (B, C)
    mx = jnp.max(xf, axis=(2, 3))                         # (B, C)

    def branch(p):
        h = jnp.maximum(p @ w1.T, 0.0)                    # (B, hidden)
        return h @ w2.T                                   # (B, C)

    out = jax.nn.sigmoid(branch(avg) + branch(mx))
    return out.reshape(B, C, 1, 1).astype(x_nchw.dtype)


if __name__ == "__main__":
    key = jax.random.PRNGKey(0)
    k_x, k_w1, k_w2, k_x2 = jax.random.split(key, 4)

    # in_planes must be >= 16 because the module hardcodes // 16.
    B, C, H, W = 2, 32, 16, 16
    hidden = C // 16

    x = jax.random.normal(k_x, (B, C, H, W), dtype=jnp.float32)
    w1 = 0.1 * jax.random.normal(k_w1, (hidden, C), dtype=jnp.float32)
    w2 = 0.1 * jax.random.normal(k_w2, (C, hidden), dtype=jnp.float32)

    # Case 1: H*W divisible by the tile — exercises the multi-tile reduction.
    out = channel_attention(x, w1, w2, hw_tile=128)
    out = jax.block_until_ready(out)
    ref = reference_channel_attention(x, w1, w2)
    assert out.shape == (B, C, 1, 1)
    assert jnp.allclose(out, ref, atol=1e-5, rtol=1e-5), "mismatch (even HW)"

    # Case 2: H*W NOT divisible by the tile — exercises the masked remainder.
    H2, W2 = 15, 15
    x2 = jax.random.normal(k_x2, (B, C, H2, W2), dtype=jnp.float32)
    out2 = channel_attention(x2, w1, w2, hw_tile=128)
    out2 = jax.block_until_ready(out2)
    ref2 = reference_channel_attention(x2, w1, w2)
    assert jnp.allclose(out2, ref2, atol=1e-5, rtol=1e-5), "mismatch (ragged HW)"

    print("KERNEL_OK")
</pallas_src>

<mosaic_0001>
module attributes {stable_mosaic.version = 11 : i64} {
  func.func @_channel_attention_kernel(%arg0: i32, %arg1: i32, %arg2: memref<2x32x128xf32, #tpu.memory_space<vmem>>, %arg3: memref<32x2xf32, #tpu.memory_space<vmem>>, %arg4: memref<2x32xf32, #tpu.memory_space<vmem>>, %arg5: memref<2x32xf32, #tpu.memory_space<vmem>>, %arg6: memref<2x32xf32, #tpu.memory_space<vmem>>, %arg7: memref<2x32xf32, #tpu.memory_space<vmem>>) attributes {dimension_semantics = [#tpu.dimension_semantics<parallel>, #tpu.dimension_semantics<arbitrary>], iteration_bounds = array<i64: 1, 2>, scalar_prefetch = 0 : i64, scratch_operands = 2 : i64, tpu.core_type = #tpu.core_type<tc>, window_params = [{transform_indices = @transform_0, window_bounds = array<i64: 2, 32, 128>}, {pipeline_mode = #tpu.pipeline_mode<synchronous>, transform_indices = @transform_1, window_bounds = array<i64: 32, 2>}, {pipeline_mode = #tpu.pipeline_mode<synchronous>, transform_indices = @transform_2, window_bounds = array<i64: 2, 32>}, {transform_indices = @transform_3, window_bounds = array<i64: 2, 32>}]} {
    %c0_i32 = arith.constant 0 : i32
    %0 = arith.cmpi eq, %arg1, %c0_i32 : i32
    %1 = arith.extui %0 : i1 to i32
    %c0_i32_0 = arith.constant 0 : i32
    %2 = arith.cmpi ne, %1, %c0_i32_0 : i32
    scf.if %2 {
      %cst_13 = arith.constant 0.000000e+00 : f32
      %15 = vector.broadcast %cst_13 : f32 to vector<2x32xf32>
      %c0_14 = arith.constant 0 : index
      %c0_15 = arith.constant 0 : index
      %16 = vector.load %arg6[%c0_14, %c0_15] : memref<2x32xf32, #tpu.memory_space<vmem>>, vector<2x32xf32>
      tpu.vector_store %arg6[%c0_14, %c0_15], %15 {strides = array<i32>} : memref<2x32xf32, #tpu.memory_space<vmem>>, vector<2x32xf32>,
      %cst_16 = arith.constant 0xFF800000 : f32
      %17 = vector.broadcast %cst_16 : f32 to vector<2x32xf32>
      %c0_17 = arith.constant 0 : index
      %c0_18 = arith.constant 0 : index
      %18 = vector.load %arg7[%c0_17, %c0_18] : memref<2x32xf32, #tpu.memory_space<vmem>>, vector<2x32xf32>
      tpu.vector_store %arg7[%c0_17, %c0_18], %17 {strides = array<i32>} : memref<2x32xf32, #tpu.memory_space<vmem>>, vector<2x32xf32>,
    } else {
    }
    %c0 = arith.constant 0 : index
    %c0_1 = arith.constant 0 : index
    %c0_2 = arith.constant 0 : index
    %3 = vector.load %arg2[%c0, %c0_1, %c0_2] : memref<2x32x128xf32, #tpu.memory_space<vmem>>, vector<2x32x128xf32>
    %c0_3 = arith.constant 0 : index
    %c0_4 = arith.constant 0 : index
    %4 = vector.load %arg6[%c0_3, %c0_4] : memref<2x32xf32, #tpu.memory_space<vmem>>, vector<2x32xf32>
    %cst = arith.constant dense<0.000000e+00> : vector<2x32xf32>
    %5 = vector.multi_reduction <add>, %3, %cst [2] : vector<2x32x128xf32> to vector<2x32xf32>
    %6 = arith.addf %4, %5 : vector<2x32xf32>
    %c0_5 = arith.constant 0 : index
    %c0_6 = arith.constant 0 : index
    %7 = vector.load %arg6[%c0_5, %c0_6] : memref<2x32xf32, #tpu.memory_space<vmem>>, vector<2x32xf32>
    tpu.vector_store %arg6[%c0_5, %c0_6], %6 {strides = array<i32>} : memref<2x32xf32, #tpu.memory_space<vmem>>, vector<2x32xf32>,
    %c0_7 = arith.constant 0 : index
    %c0_8 = arith.constant 0 : index
    %8 = vector.load %arg7[%c0_7, %c0_8] : memref<2x32xf32, #tpu.memory_space<vmem>>, vector<2x32xf32>
    %cst_9 = arith.constant dense<0xFF800000> : vector<2x32xf32>
    %9 = vector.multi_reduction <maximumf>, %3, %cst_9 [2] : vector<2x32x128xf32> to vector<2x32xf32>
    %10 = arith.maximumf %8, %9 : vector<2x32xf32>
    %c0_10 = arith.constant 0 : index
    %c0_11 = arith.constant 0 : index
    %11 = vector.load %arg7[%c0_10, %c0_11] : memref<2x32xf32, #tpu.memory_space<vmem>>, vector<2x32xf32>
    tpu.vector_store %arg7[%c0_10, %c0_11], %10 {strides = array<i32>} : memref<2x32xf32, #tpu.memory_space<vmem>>, vector<2x32xf32>,
    %c1_i32 = arith.constant 1 : i32
    %12 = arith.cmpi eq, %arg1, %c1_i32 : i32
    %13 = arith.extui %12 : i1 to i32
    %c0_i32_12 = arith.constant 0 : i32
    %14 = arith.cmpi ne, %13, %c0_i32_12 : i32
    scf.if %14 {
      %c0_13 = arith.constant 0 : index
      %c0_14 = arith.constant 0 : index
      %15 = vector.load %arg6[%c0_13, %c0_14] : memref<2x32xf32, #tpu.memory_space<vmem>>, vector<2x32xf32>
      %cst_15 = arith.constant 3.906250e-03 : f32
      %16 = vector.broadcast %cst_15 : f32 to vector<2x32xf32>
      %17 = arith.mulf %15, %16 : vector<2x32xf32>
      %c0_16 = arith.constant 0 : index
      %c0_17 = arith.constant 0 : index
      %18 = vector.load %arg7[%c0_16, %c0_17] : memref<2x32xf32, #tpu.memory_space<vmem>>, vector<2x32xf32>
      %19 = tpu.concatenate %17, %18 in 0 : vector<2x32xf32>, vector<2x32xf32> -> vector<4x32xf32>
      %c0_18 = arith.constant 0 : index
      %c0_19 = arith.constant 0 : index
      %20 = vector.load %arg3[%c0_18, %c0_19] : memref<32x2xf32, #tpu.memory_space<vmem>>, vector<32x2xf32>
      %cst_20 = arith.constant dense<0.000000e+00> : vector<4x2xf32>
      %21 = tpu.matmul %19, %20, %cst_20 {dimension_numbers = #tpu.dot_dimension_numbers<[1], [0], [0], [1], [0, 0, 1, 1], [], []>} : vector<4x32xf32>, vector<32x2xf32>, vector<4x2xf32> -> vector<4x2xf32>
      %cst_21 = arith.constant 0.000000e+00 : f32
      %22 = vector.broadcast %cst_21 : f32 to vector<4x2xf32>
      %23 = arith.maximumf %21, %22 : vector<4x2xf32>
      %24 = vector.extract_strided_slice %23 {offsets = [0, 0], sizes = [2, 2], strides = [1, 1]} : vector<4x2xf32> to vector<2x2xf32>
      %25 = vector.extract_strided_slice %23 {offsets = [2, 0], sizes = [2, 2], strides = [1, 1]} : vector<4x2xf32> to vector<2x2xf32>
      %26 = arith.addf %24, %25 : vector<2x2xf32>
      %c0_22 = arith.constant 0 : index
      %c0_23 = arith.constant 0 : index
      %27 = vector.load %arg4[%c0_22, %c0_23] : memref<2x32xf32, #tpu.memory_space<vmem>>, vector<2x32xf32>
      %cst_24 = arith.constant dense<0.000000e+00> : vector<2x32xf32>
      %28 = tpu.matmul %26, %27, %cst_24 {dimension_numbers = #tpu.dot_dimension_numbers<[1], [0], [0], [1], [0, 0, 1, 1], [], []>} : vector<2x2xf32>, vector<2x32xf32>, vector<2x32xf32> -> vector<2x32xf32>
      %29 = arith.negf %28 : vector<2x32xf32>
      %30 = math.exp %29 : vector<2x32xf32>
      %cst_25 = arith.constant 1.000000e+00 : f32
      %31 = vector.broadcast %cst_25 : f32 to vector<2x32xf32>
      %32 = arith.addf %31, %30 : vector<2x32xf32>
      %33 = arith.divf %31, %32 : vector<2x32xf32>
      %c0_26 = arith.constant 0 : index
      %c0_27 = arith.constant 0 : index
      %34 = vector.load %arg5[%c0_26, %c0_27] : memref<2x32xf32, #tpu.memory_space<vmem>>, vector<2x32xf32>
      tpu.vector_store %arg5[%c0_26, %c0_27], %33 {strides = array<i32>} : memref<2x32xf32, #tpu.memory_space<vmem>>, vector<2x32xf32>,
    } else {
    }
    return
  }
  func.func @transform_0(%arg0: i32, %arg1: i32) -> (i32, i32, i32) {
    %c0_i32 = arith.constant 0 : i32
    %c0_i32_0 = arith.constant 0 : i32
    return %arg0, %c0_i32, %arg1 : i32, i32, i32
  }
  func.func @transform_1(%arg0: i32, %arg1: i32) -> (i32, i32) {
    %c0_i32 = arith.constant 0 : i32
    %c0_i32_0 = arith.constant 0 : i32
    %c0_i32_1 = arith.constant 0 : i32
    return %c0_i32, %c0_i32_0 : i32, i32
  }
  func.func @transform_2(%arg0: i32, %arg1: i32) -> (i32, i32) {
    %c0_i32 = arith.constant 0 : i32
    %c0_i32_0 = arith.constant 0 : i32
    %c0_i32_1 = arith.constant 0 : i32
    return %c0_i32, %c0_i32_0 : i32, i32
  }
  func.func @transform_3(%arg0: i32, %arg1: i32) -> (i32, i32) {
    %c0_i32 = arith.constant 0 : i32
    %c0_i32_0 = arith.constant 0 : i32
    return %arg0, %c0_i32 : i32, i32
  }
}

</mosaic_0001>

<bundles_post_ra>
// kernel: tpu_custom_call.1
= control target key start
LH: loop header
LB: loop body
LE: loop exit
PB: predicated region body
PF: predicated region fallthrough
CT: control target
= control target key end

     0   :  { %8 = vsyncpa [#allocation5], 0  ;;  %s1057_s0 = inlined_call_operand.hbm [shape: f32[2,32,256], index: 0, kind: input, shape index: {}]   ;;  %s1058_s1 = inlined_call_operand.vmem [shape: f32[32,2], index: 1, kind: input, shape index: {}]   ;;  %s1059_s2 = inlined_call_operand.vmem [shape: f32[2,32], index: 2, kind: input, shape index: {}]   ;;  %s1060_s3 = inlined_call_operand.hbm [shape: f32[2,32], index: 3, kind: output, shape index: {}]  }
   0x1   :  { %10 = vsyncpa [#allocation5 + $0x1], 0 }
   0x2   :  { %11 = vsyncpa [#allocation6], 0  ;;  %s872_s12 = smov 0   ;;  %s874_s13 = smov 0  }
   0x3   :  { %s876_s14 = smov 0   ;;  %s878_s15 = smov 0  }
   0x4   :  { %s880_s16 = smov 0   ;;  %s882_s17 = smov 0  }
   0x5 LB: > { %s610_s18 = sadd.s32 4294967295, %s840_s17   ;;  %s26_s19 = sadd.s32 1, %s836_s16  ;;  %s840_s17 = sphi %s882_s17, %s17_s17   ;;  %s836_s16 = sphi %s880_s16, %s1070_s16   ;;  %s832_s15 = sphi %s878_s15, %s1069_s15   ;;  %s828_s14 = sphi %s876_s14, %s1068_s14   ;;  %s824_s13 = sphi %s874_s13, %s1067_s13   ;;  %s820_s12 = sphi %s872_s12, %s1066_s12  }
   0x6   : > { %p27_p0 = scmp.ge.s32.totalorder %s26_s19, 2  ;;  %s38_s20 = sadd.s32 1, %s828_s14 }
   0x7   : > { %p45_p1 = scmp.ne.s32.totalorder %s828_s14, %s824_s13  ;;  %p46_p2 = scmp.eq.s32.totalorder %s840_s17, 0 }
   0x8   : > { %s1072_s19 = smov (%p27_p0, %s26_s19), 0  ;;  %p51_p4 = scmp.ne.s32.totalorder %s824_s13, %s820_s12 }
   0x9   : > { %p908_p3 = por %p46_p2, %p45_p1  ;;  %s34_s22 = ssub.s32 %s836_s16, %s1072_s19 }
   0xa   : > { %p52_p5 = scmp.eq.s32.totalorder %s610_s18, 0  ;;  %p36_p6 = scmp.eq.s32.totalorder %s34_s22, 0 }
   0xb   : > { %p666_p8 = scmp.lt.s32.totalorder %s840_s17, 2  ;;  %s149_s25 = sand.u32 1, %s828_s14  }
   0xc   : > { %p917_p7 = por %p52_p5, %p51_p4  ;;  %s614_s26 = sshll.u32 %s836_s16, 7 }
   0xd   : > { %s923_s24 = scalar_select %p36_p6, %s828_s14, %s38_s20  }
   0xe   : > { %s613_s27 = sshll.u32 %s149_s25, 6  ;;  %s930_s30 = scalar_lea.hbm %s1057_s0, %s614_s26 }
   0xf   : > { %s153_s4 = scalar_lea.vmem [#allocation4], %s613_s27  ;;  %p934_p9 = pnand %p666_p8, %p908_p3 }
  0x10   : > { %s162_s5 = sshll.u32 %s153_s4, 4  ;;  %s941_s7 = scalar_lea.sflag [#allocation5], %s149_s25  ;;  %s938_s5 = int_to_ptr.vmem [resolvable:$true] %s162_s5 }
  0x11   : > { %s730_s8 = scalar_lea.hbm %s930_s30, 1024  ;;  %p732_p12 = pneg %p934_p9 }
  0x12   : > { %p731_p11 = scmp.ne.s32.totalorder %s930_s30, %s730_s8  ;;  %s735_s11 = scalar_lea.hbm %s1057_s0, 2048 }
  0x13   : > { %p736_p1 = scmp.lt.u32.totalorder %s930_s30, %s1057_s0  ;;  %p737_p2 = scmp.lt.u32.totalorder %s735_s11, %s730_s8 }
  0x14   : > { %p733_p13 = pnand %p732_p12, %p731_p11  ;;  %p739_p4 = scmp.lt.u32.totalorder %s730_s8, %s930_s30 }
  0x15   : > { %p738_p3 = por %p737_p2, %p736_p1 }
  0x16   : > { %p734_p0 = pneg %p733_p13 }
  0x17   : > { %p740_p5 = por %p739_p4, %p738_p3 }
  0x19   : > { %p741_p6 = pnand %p740_p5, %p734_p0 }
  0x1b   : > { %744 = shalt.err (!%p741_p6)
}
  0x1c   : > { %s745_s21 = scalar_lea.vmem %s938_s5, 1024  ;;  %s842_s22 = smov [#allocation4]  }
  0x1d   : > { %p746_p8 = scmp.ne.s32.totalorder %s938_s5, %s745_s21  ;;  %s750_s25 = sshll.u32 %s842_s22, 4  ;;  %s751_s25 = int_to_ptr.vmem [resolvable:$false] %s750_s25 }
  0x1e   : > { %s752_s26 = scalar_lea.vmem %s751_s25, 2048  ;;  %p753_p10 = scmp.lt.s32.totalorder %s938_s5, %s751_s25 }
  0x1f   : > { %p748_p11 = pnand %p746_p8, %p732_p12  ;;  %p754_p1 = scmp.lt.s32.totalorder %s752_s26, %s745_s21 }
  0x21   : > { %p749_p13 = pneg %p748_p11  ;;  %p755_p2 = por %p754_p1, %p753_p10 }
  0x23   : > { %p756_p3 = pnand %p755_p2, %p749_p13 }
  0x25   : > { %759 = shalt.err (!%p756_p3)
}
  0x26   : > { %s843_s27 = smov 256   ;;  %s844_s28 = smov 128  }
  0x27   : > { %s845_s29 = smov 8   ;;  %p170_p12 = scmp.lt.s32.totalorder %s840_s17, 3 }
  0x28   : > { %665 = dma.hbm_to_vmem [thread:$0]  (!%p934_p9), %s930_s30, 1024, %s938_s5, %s941_s7, %s843_s27, %s844_s28, %s845_s29  }
  0x29   : > { %p1064_p0 = scmp.ge.s32.totalorder %s840_s17, 1 }
  0x2b   : > { %p171_p4 = pnand %p1064_p0, %p170_p12 }
  0x2c   : > { %s176_s4 = sand.u32 (!%p171_p4), 1, %s824_s13  }
  0x2d   : > { %174 = sbr.rel (%p171_p4) target bundleno = 733 (0x2dd), region = 32  ;;  %s616_s8 = sshll.u32 (!%p171_p4), %s176_s4, 6 }
  0x2e   : > { %s177_s9 = scalar_lea.sflag (!%p171_p4), [#allocation5], %s176_s4  ;;  %s180_s10 = scalar_lea.vmem (!%p171_p4), [#allocation4], %s616_s8 }
  0x34   : > { %811 = dma.done.wait (%p917_p7), %s177_s9, 1024  }
  0x35   : > { %813 = vsyncadd (%p917_p7), %s177_s9, 4294966272  ;;  %p617_p10 = scmp.ne.s32.totalorder %s832_s15, 0 }
  0x36   : > { %vm203_vm0 = vcmask (!%p617_p10), 254976   ;;  %v846_v0 = vmov (!%p617_p10), 0.0   ;;  %v847_v1 = vmov (!%p617_p10), -inf  }
  0x37   : > { %202 = sbr.rel (%p617_p10) target bundleno = 62 (0x3e), region = 40  ;;  %204 = vst.msk [vmem:[#allocation2] sm:$0x3] (!%p617_p10), %vm203_vm0, %v846_v0  ;;  %205 = vst.msk [vmem:[#allocation3] sm:$0x3] (!%p617_p10), %vm203_vm0, %v847_v1 }
  0x3e PF: > { %v210_v2 = vld [vmem:[%s180_s10 + $0x20] sm:$0xff]  ;;  %v211_v4 = vld [vmem:[%s180_s10 + $0x28] sm:$0xff]  ;;  %v212_v6 = vld [vmem:[%s180_s10 + $0x30] sm:$0xff]  ;;  %v239_v14 = vlaneseq  ;;  %vm250_vm1 = vcmask 130112   ;;  %vm257_vm2 = vcmask 195712   ;;  %vm264_vm3 = vcmask 261312  }
  0x3f   : > { %v206_v3 = vld [vmem:[%s180_s10] sm:$0xff]  ;;  %223 = vadd.xlane.f32.xlu1 %v210_v2  ;;  %v207_v5 = vld [vmem:[%s180_s10 + $0x8] sm:$0xff]  ;;  %v208_v7 = vld [vmem:[%s180_s10 + $0x10] sm:$0xff]  ;;  %vm285_vm4 = vcmask 1041409   ;;  %vm289_vm5 = vcmask 254976   ;;  %p618_p7 = scmp.ne.s32.totalorder %s832_s15, 1 }
  0x40   : > { %215 = vadd.xlane.f32.xlu0 %v206_v3  ;;  %v213_v8 = vld [vmem:[%s180_s10 + $0x38] sm:$0xff]  ;;  %v240_v17 = vand.u32 127, %v239_v14  ;;  %v242_v21 = vshrl.u32 %v239_v14, 7  ;;  %vm849_vm6 = vmmov (!%p618_p7), 0   ;;  %vm368_vm7 = vcmask (!%p618_p7), 1041408  }
  0x41   : > { %v209_v9 = vld [vmem:[%s180_s10 + $0x18] sm:$0xff]  ;;  %vm374_vm8 = vcmask (!%p618_p7), 261120   ;;  %vm454_vm9 = vcmask (!%p618_p7), 15360  }
  0x42   : > { %v245_v18 = vadd.s32 4294967288, %v240_v17  ;;  %v252_v22 = vadd.s32 4294967280, %v240_v17  ;;  %v259_v26 = vadd.s32 4294967272, %v240_v17  ;;  %v243_v27 = vsub.s32 %v240_v17, %v242_v21  ;;  %v214_v52 = vld [vmem:[#allocation2] sm:$0x3] }
  0x43   : > { %225 = vadd.xlane.f32.xlu1 %v211_v4  ;;  %v291_v1 = vld [vmem:[#allocation3] sm:$0x3] }
  0x44   : > { %217 = vadd.xlane.f32.xlu0 %v207_v5  ;;  %v248_v23 = vsub.s32 %v245_v18, %v242_v21  ;;  %v255_v28 = vsub.s32 %v252_v22, %v242_v21  ;;  %v262_v33 = vsub.s32 %v259_v26, %v242_v21 }
  0x47   : > { %294 = vmax.xlane.f32.xlu1 %v207_v5 }
  0x48   : > { %292 = vmax.xlane.f32.xlu0 %v206_v3 }
  0x4b   : > { %302 = vmax.xlane.f32.xlu1 %v211_v4 }
  0x4c   : > { %300 = vmax.xlane.f32.xlu0 %v210_v2 }
  0x4f   : > { %227 = vadd.xlane.f32.xlu1 %v212_v6 }
  0x50   : > { %219 = vadd.xlane.f32.xlu0 %v208_v7 }
  0x53   : > { %304 = vmax.xlane.f32.xlu1 %v212_v6  ;;  %v370_v6 = vld [vmem:[%s1058_s1] sm:$0xff] (!%p618_p7) }
  0x54   : > { %296 = vmax.xlane.f32.xlu0 %v208_v7  ;;  %v371_v7 = vld [vmem:[%s1058_s1 + $0x8] sm:$0xff] (!%p618_p7) }
  0x57   : > { %229 = vadd.xlane.f32.xlu1 %v213_v8 }
  0x58   : > { %221 = vadd.xlane.f32.xlu0 %v209_v9 }
  0x5b   : > { %306 = vmax.xlane.f32.xlu1 %v213_v8  ;;  %v372_v8 = vld [vmem:[%s1058_s1 + $0x10] sm:$0xff] (!%p618_p7) }
  0x5c   : > { %298 = vmax.xlane.f32.xlu0 %v209_v9  ;;  %v848_v9 = vmov (!%p618_p7), 0.0|0.0  }
  0x5d   : > { %650 = vmatprep.subr.bf16.mxu0 (!%p618_p7), %v848_v9 }
  0xcc   : > { %v224_v10 = vpop.xlane.xlu1 %223 }
  0xcd   : > { %v216_v11 = vpop.xlane.xlu0 %215  ;;  %v269_v34 = vrot.slane %v224_v10, %v243_v27  ;;  %v651_v10 = vpack.c.bf16 (!%p618_p7), %v371_v7, %v370_v6 }
  0xce   : > { %v244_v35 = vrot.slane %v216_v11, %v243_v27  ;;  %v373_v11 = vld [vmem:[%s1058_s1 + $0x18] sm:$0xff] (!%p618_p7) }
  0xcf   : > { %652 = vmatpush3.bf16.msra.mxu0 (!%p618_p7), %v651_v10 }
  0xd0   : > { %v226_v12 = vpop.xlane.xlu1 %225  ;;  %653 = vmatprep.subr.bf16.mxu0 (!%p618_p7), %v848_v9 }
  0xd1   : > { %v218_v13 = vpop.xlane.xlu0 %217  ;;  %v273_v29 = vrot.slane %v226_v12, %v248_v23  ;;  %v850_v12 = vmov (!%p618_p7), 0.0  }
  0xd2   : > { %v249_v30 = vrot.slane %v218_v13, %v248_v23  ;;  %642 = vmatprep.mubr.msk.f32.mxu0 (!%p618_p7), %vm849_vm6, %v850_v12  ;;  %645 = vmatprep.subr.mxu1 (!%p618_p7), %v850_v12 }
  0xd3   : > { %v274_v38 = vsel %vm250_vm1, %v273_v29, %v269_v34  ;;  %647 = vmatprep.mubr.msk.f32.mxu1 (!%p618_p7), %vm849_vm6, %v850_v12 }
  0xd4   : > { %v295_v15 = vpop.xlane.xlu1 %294  ;;  %v251_v39 = vsel %vm250_vm1, %v249_v30, %v244_v35 }
  0xd5   : > { %v293_v16 = vpop.xlane.xlu0 %292  ;;  %v323_v40 = vrot.slane %v295_v15, %v248_v23  ;;  %v654_v15 = vpack.c.bf16 (!%p618_p7), %v373_v11, %v372_v8 }
  0xd6   : > { %v319_v41 = vrot.slane %v293_v16, %v243_v27 }
  0xd7   : > { %655 = vmatpush3.bf16.msra.mxu0 (!%p618_p7), %v654_v15 }
  0xd8   : > { %v303_v19 = vpop.xlane.xlu1 %302  ;;  %v324_v55 = vsel %vm250_vm1, %v323_v40, %v319_v41 }
  0xd9   : > { %v301_v20 = vpop.xlane.xlu0 %300  ;;  %v342_v44 = vrot.slane %v303_v19, %v248_v23  ;;  %v453_v19 = vld [vmem:[%s1059_s2] sm:$0x3] (!%p618_p7) }
  0xda   : > { %v338_v45 = vrot.slane %v301_v20, %v243_v27  ;;  %646 = vmatpush3.msk.msra.mxu1 (!%p618_p7), %vm368_vm7, %v453_v19 }
  0xdc   : > { %v228_v24 = vpop.xlane.xlu1 %227  ;;  %v343_v59 = vsel %vm250_vm1, %v342_v44, %v338_v45 }
  0xdd   : > { %v220_v25 = vpop.xlane.xlu0 %219  ;;  %v278_v36 = vrot.slane %v228_v24, %v255_v28 }
  0xde   : > { %v256_v37 = vrot.slane %v220_v25, %v255_v28 }
  0xdf   : > { %v279_v48 = vsel %vm257_vm2, %v278_v36, %v274_v38 }
  0xe0   : > { %v305_v31 = vpop.xlane.xlu1 %304  ;;  %v258_v49 = vsel %vm257_vm2, %v256_v37, %v251_v39 }
  0xe1   : > { %v297_v32 = vpop.xlane.xlu0 %296  ;;  %v347_v50 = vrot.slane %v305_v31, %v255_v28 }
  0xe2   : > { %v328_v51 = vrot.slane %v297_v32, %v255_v28 }
  0xe3   : > { %v348_v63 = vsel %vm257_vm2, %v347_v50, %v343_v59 }
  0xe4   : > { %v230_v42 = vpop.xlane.xlu1 %229  ;;  %v329_v0 = vsel %vm257_vm2, %v328_v51, %v324_v55 }
  0xe5   : > { %v222_v43 = vpop.xlane.xlu0 %221  ;;  %v283_v46 = vrot.slane %v230_v42, %v262_v33 }
  0xe6   : > { %v263_v47 = vrot.slane %v222_v43, %v262_v33 }
  0xe7   : > { %v284_v53 = vsel %vm264_vm3, %v283_v46, %v279_v48 }
  0xe8   : > { %v265_v54 = vsel %vm264_vm3, %v263_v47, %v258_v49  ;;  %v307_v57 = vpop.xlane.xlu1 %306 }
  0xe9   : > { %v286_v56 = vsel %vm285_vm4, %v284_v53, %v265_v54  ;;  %v299_v58 = vpop.xlane.xlu0 %298  ;;  %v352_v61 = vrot.slane %v307_v57, %v262_v33 }
  0xea   : > { %v288_v60 = vadd.f32 %v286_v56, %v214_v52  ;;  %v333_v62 = vrot.slane %v299_v58, %v262_v33  ;;  %361 = sbr.rel (%p618_p7) target bundleno = 708 (0x2c4), region = 44 }
  0xeb   : > { %v353_v2 = vsel %vm264_vm3, %v352_v61, %v348_v63 }
  0xec   : > { %290 = vst.msk [vmem:[#allocation2] sm:$0x3] %vm289_vm5, %v288_v60  ;;  %v334_v3 = vsel %vm264_vm3, %v333_v62, %v329_v0 }
  0xed   : > { %v354_v4 = vsel %vm285_vm4, %v353_v2, %v334_v3 }
  0xee   : > { %v356_v5 = vmax.f32 %v291_v1, %v354_v4 }
  0xf0   : > { %357 = vst.msk [vmem:[#allocation3] sm:$0x3] %vm289_vm5, %v356_v5 }
  0xf3   : > { %v362_v13 = vld [vmem:[#allocation2] sm:$0x3] }
  0xf4   : > { %v363_v16 = vmul.f32 0.00390625, %v362_v13 }
  0xf7   : > { %v364_v14 = vld [vmem:[#allocation3] sm:$0x3] }
  0xf8   : > { %v366_v17 = vrot.slane %v364_v14, 6 }
  0xfa   : > { %v369_v18 = vsel %vm368_vm7, %v363_v16, %v366_v17 }
  0xfb   : > { %643 = vmatmul.mubr.msk.f32.vlgmr.msra.gmra.mrb[0].mxu0 %vm374_vm8, %v369_v18 }
 0x1ce   : > { %v444_v20 = vpop.f32.mrb[0].mxu0 }
 0x1cf   : > { %v448_v21 = vmax.f32 %v444_v20, 0.0  ;;  %v644_v22 = vpop.f32.mrb[1].mxu0 }
 0x1d1   : > { %v450_v23 = vrot.slane %v448_v21, 2 }
 0x1d3   : > { %v452_v24 = vadd.f32 %v450_v23, %v448_v21 }
 0x1d5   : > { %648 = vmatmul.mubr.msk.f32.vlgmr.msra.gmra.mrb[0].mxu1 %vm454_vm9, %v452_v24 }
 0x2a8   : > { %v527_v25 = vpop.f32.mrb[0].mxu1 }
 0x2a9   : > { %v622_v26 = vmul.f32 -1.442695, %v527_v25  ;;  %v649_v27 = vpop.f32.mrb[1].mxu1 }
 0x2ab   : > { %726 = vpow2.f32 %v622_v26 }
 0x2b5   : > { %v727_v28 = vpop.eup %726 }
 0x2b6   : > { %v534_v29 = vadd.f32 1.0, %v727_v28 }
 0x2b8   : > { %728 = vrcp.f32 %v534_v29 }
 0x2c2   : > { %v729_v30 = vpop.eup %728 }
 0x2c3   : > { %537 = vst.msk [vmem:[#allocation7] sm:$0x3] %vm289_vm5, %v729_v30 }
 0x2c4 PF: > { %p1013_p9 = scmp.eq.s32.totalorder %s610_s18, 1  ;;  %s851_s25 = smov [#allocation7]  }
 0x2c5   : > { %s547_s26 = sshll.u32 %s851_s25, 4  ;;  %s548_s26 = int_to_ptr.vmem [resolvable:$true] %s547_s26 }
 0x2c6   : > { %s760_s27 = scalar_lea.vmem %s548_s26, 32  ;;  %p767_p11 = scmp.lt.s32.totalorder %s548_s26, %s548_s26 }
 0x2c7   : > { %p761_p5 = scmp.ne.s32.totalorder %s548_s26, %s760_s27  ;;  %p768_p13 = scmp.lt.s32.totalorder %s760_s27, %s760_s27 }
 0x2c9   : > { %p762_p6 = pnand %p761_p5, %p1013_p9  ;;  %p769_p1 = por %p768_p13, %p767_p11 }
 0x2cb   : > { %p763_p8 = pneg %p762_p6 }
 0x2cd   : > { %p770_p2 = pnand %p769_p1, %p763_p8 }
 0x2cf   : > { %773 = shalt.err (!%p770_p2)
}
 0x2d0   : > { %s774_s18 = scalar_lea.hbm %s1060_s3, 32 }
 0x2d1   : > { %p775_p3 = scmp.ne.s32.totalorder %s1060_s3, %s774_s18  ;;  %p780_p4 = scmp.lt.u32.totalorder %s774_s18, %s1060_s3 }
 0x2d3   : > { %p776_p12 = pnand %p775_p3, %p1013_p9 }
 0x2d5   : > { %p777_p0 = pneg %p776_p12 }
 0x2d7   : > { %p782_p10 = pnand %p780_p4, %p777_p0 }
 0x2d9   : > { %785 = shalt.err (!%p782_p10)
}
 0x2da   : > { %659 = dma.vmem_to_hbm [thread:$0]  (%p1013_p9), %s548_s26, 32, %s1060_s3, [#allocation6]  }
 0x2db   : > { %815 = dma.done.wait (%p1013_p9), [#allocation6], 32  }
 0x2dc   : > { %817 = vsyncadd (%p1013_p9), [#allocation6], 4294967264 }
 0x2dd PF: > { %s17_s17 = sadd.s32 1, %s840_s17   ;;  %s1066_s12 = smov %s824_s13 }
 0x2de   : > { %p14_p7 = scmp.ge.s32.totalorder %s17_s17, 4   ;;  %s1067_s13 = smov %s828_s14 }
 0x2df   : > { %s1068_s14 = smov %s923_s24  ;;  %s1069_s15 = smov %s836_s16 }
 0x2e0   : > { %s1070_s16 = smov %s1072_s19  ;;  %16 = sbr.rel (!%p14_p7) target bundleno = 5 (0x5), region = 78 }
 0x2e7   :  { %560 = vsyncpa [#allocation5], 1 }
 0x2e8   :  { %562 = vsyncpa [#allocation5 + $0x1], 1 }
 0x2e9   :  { %563 = vsyncpa [#allocation6], 1 }
 0x2ea   :  { %565 = vsyncpa [#allocation6 + $0x1], 1 }

</bundles_post_ra>
